<compile_context>
chip_gen: v6e
topology: v6e:2x2x1
jax: 0.10.0
libtpu: 0.0.40
codegen_flags: <defaults>
</compile_context>

<pallas_src>
import functools

import jax
import jax.numpy as jnp
from jax.experimental import pallas as pl
from jax.experimental.pallas import tpu as pltpu

_MATMUL_DTYPE = jnp.bfloat16


def _cdiv(a: int, b: int) -> int:
    return -(-a // b)


def _round_up(x: int, m: int) -> int:
    return _cdiv(x, m) * m


def _vmem_limits():
    """Generation-dependent scoped-VMEM limit and tile-sizing budget."""
    try:
        cap = int(pltpu.get_tpu_info().vmem_capacity_bytes)
    except Exception:
        cap = 64 * 1024 * 1024          # conservative (v7x per-TC) fallback
    limit = min((cap * 3) // 4, 112 * 1024 * 1024)   # v7x ~48 MiB, v5e/v6e ~96 MiB
    budget = (limit * 3) // 4
    return limit, budget


_VMEM_LIMIT_BYTES, _VMEM_TILE_BUDGET = _vmem_limits()


# ----------------------------- kernels --------------------------------------
def _agg_sum_kernel(s_ref, n_ref, w_ref, b_ref, o_ref):
    # res = self + neighbor (f32 VALU); y = res @ W (bf16 MXU, f32 acc) + b; relu
    res = s_ref[...].astype(jnp.float32) + n_ref[...].astype(jnp.float32)
    y = jnp.dot(res.astype(w_ref.dtype), w_ref[...],
                preferred_element_type=jnp.float32)
    y = y + b_ref[...]                      # b: [1, lane_dim] broadcasts over rows
    o_ref[...] = jnp.maximum(y, 0.0).astype(o_ref.dtype)


def _agg_concat_kernel(s_ref, n_ref, w1_ref, w2_ref, b_ref, o_ref):
    # cat([s, n], -1) @ W.T == s @ W1t + n @ W2t (two resident weight halves)
    y = jnp.dot(s_ref[...].astype(w1_ref.dtype), w1_ref[...],
                preferred_element_type=jnp.float32)
    y = y + jnp.dot(n_ref[...].astype(w2_ref.dtype), w2_ref[...],
                    preferred_element_type=jnp.float32)
    y = y + b_ref[...]
    o_ref[...] = jnp.maximum(y, 0.0).astype(o_ref.dtype)


# ----------------------------- param prep (hoisted, run once) ---------------
def _block_diag(w, g):
    """[k, m] -> [g*k, g*m] block-diagonal with g copies of w on the diagonal."""
    k, m = w.shape
    eye = jnp.eye(g, dtype=w.dtype)
    return (eye[:, None, :, None] * w[None, :, None, :]).reshape(g * k, g * m)


def prepare_aggregator_params(weight, bias, aggregator="sum",
                              matmul_dtype=_MATMUL_DTYPE, lane_pack=True):
    """weight: PyTorch Linear weight ([dim, dim] for 'sum', [dim, 2*dim] for
    'concat'); bias: [dim].

    Pre-transposes, splits ('concat'), lane-packs (block-diagonal expansion by
    g = 128 // dim when dim < 128 divides 128) and casts to the matmul dtype,
    all ONCE, so the per-call hot path never touches the raw weight again.
    Returns (*weights, bias_2d).
    """
    w = jnp.asarray(weight, dtype=jnp.float32)
    b = jnp.asarray(bias, dtype=jnp.float32)
    out_dim = w.shape[0]

    g = 1
    if lane_pack and out_dim < 128 and 128 % out_dim == 0:
        g = 128 // out_dim

    wt = w.T                                            # [in_dim, out_dim]
    if aggregator == "sum":
        w_list = [wt]                                   # [dim, dim]
    elif aggregator == "concat":
        w_list = [wt[:out_dim, :], wt[out_dim:, :]]     # two [dim, dim] halves
    else:
        raise NotImplementedError(aggregator)

    if g > 1:
        w_list = [_block_diag(x, g) for x in w_list]    # [g*dim, g*dim]
        b2d = jnp.tile(b.reshape(1, -1), (1, g))        # [1, g*dim]
    else:
        b2d = b.reshape(1, -1)                          # [1, dim]

    w_list = [x.astype(matmul_dtype) for x in w_list]
    return tuple(w_list) + (b2d,)


# ----------------------------- tile sizing -----------------------------------
def _pick_row_tile(rows, lane_padded, bytes_per_elem, resident_bytes,
                   budget, block_rows):
    if block_rows is not None:
        tm = max(8, _round_up(block_rows, 8))
    else:
        # 2 streamed inputs + 1 streamed output, each double-buffered.
        per_row = lane_padded * bytes_per_elem * 3 * 2
        avail = max(budget - resident_bytes, per_row * 8)
        tm = max(8, min((avail // per_row) // 8 * 8, 4096))
        # keep the grid at ~>=8 steps (v7x megacore + pipelining), but never
        # shrink the tile below 256 rows just to manufacture extra steps.
        tm = min(tm, max(256, _round_up(_cdiv(rows, 8), 8)))
    if rows <= 8:
        return max(1, rows)                # full-extent block (allowed)
    return max(8, min(tm, (rows // 8) * 8))


# ----------------------------- wrapper ---------------------------------------
@functools.partial(jax.jit, static_argnames=("aggregator", "block_rows"))
def aggregator_forward(self_vectors, neighbor_vectors, params,
                       aggregator="sum", block_rows=None):
    """self/neighbor: [N, dim]; params from prepare_aggregator_params."""
    N, dim = self_vectors.shape
    *weights, b2d = params
    lane_dim = weights[0].shape[-1]
    g = lane_dim // dim
    assert lane_dim == g * dim, "params do not match the feature dim"

    if g > 1 and N % g != 0:
        # Lane-packing not applicable for this N: recover the unpacked weights
        # from the first diagonal block (tiny slices; weight is < 128x128).
        in_dim = weights[0].shape[0] // g
        weights = [w[:in_dim, :dim] for w in weights]
        b2d = b2d[:, :dim]
        g, lane_dim = 1, dim

    if aggregator == "sum":
        kernel = _agg_sum_kernel
        assert len(weights) == 1
    elif aggregator == "concat":
        kernel = _agg_concat_kernel
        assert len(weights) == 2
    else:
        raise NotImplementedError(aggregator)

    # Lane-dense view: [N, dim] -> [N // g, g * dim] (free row-major reshape).
    if g > 1:
        s = self_vectors.reshape(N // g, lane_dim)
        n = neighbor_vectors.reshape(N // g, lane_dim)
    else:
        s, n = self_vectors, neighbor_vectors
    rows = N // g

    # Row-tile sizing against the generation-dependent VMEM budget; resident
    # weight/bias are counted double-buffered (pipeline default).
    lane_p = _round_up(lane_dim, 128)
    bytes_per_elem = self_vectors.dtype.itemsize
    resident = (2 * sum(int(w.size) * w.dtype.itemsize for w in weights)
                + 2 * 8 * lane_p * 4)                    # bias padded to (8,128)
    tm = _pick_row_tile(rows, lane_p, bytes_per_elem, resident,
                        _VMEM_TILE_BUDGET, block_rows)

    grid = (pl.cdiv(rows, tm),)            # trailing partial block masked by Pallas

    in_specs = [
        pl.BlockSpec((tm, lane_dim), lambda i: (i, 0)),   # self  (streamed)
        pl.BlockSpec((tm, lane_dim), lambda i: (i, 0)),   # neigh (streamed)
    ]
    in_specs += [pl.BlockSpec(w.shape, lambda i: (0, 0)) for w in weights]  # resident
    in_specs += [pl.BlockSpec((1, lane_dim), lambda i: (0, 0))]             # bias

    out = pl.pallas_call(
        kernel,
        out_shape=jax.ShapeDtypeStruct((rows, lane_dim), self_vectors.dtype),
        grid=grid,
        in_specs=in_specs,
        out_specs=pl.BlockSpec((tm, lane_dim), lambda i: (i, 0)),
        compiler_params=pltpu.CompilerParams(
            dimension_semantics=("parallel",),
            vmem_limit_bytes=_VMEM_LIMIT_BYTES),
    )(s, n, *weights, b2d)

    return out.reshape(N, dim) if g > 1 else out


# ------------------------- pure-JAX reference --------------------------------
def aggregator_reference(self_vectors, neighbor_vectors, weight, bias,
                         aggregator="sum", matmul_dtype=jnp.float32):
    if aggregator == "sum":
        res = self_vectors + neighbor_vectors
    else:
        res = jnp.concatenate([self_vectors, neighbor_vectors], axis=1)
    y = jnp.dot(res.astype(matmul_dtype), weight.T.astype(matmul_dtype),
                preferred_element_type=jnp.float32) + bias
    return jax.nn.relu(y)


# ------------------------------ main ------------------------------------------
if __name__ == "__main__":
    key = jax.random.PRNGKey(0)
    dim = 32

    k1, k2, k3, k4, k5, k6 = jax.random.split(key, 6)
    # PyTorch Linear shapes: sum W [dim, dim], b [dim]; concat W [dim, 2*dim].
    w_sum = jax.random.normal(k3, (dim, dim), dtype=jnp.float32) * 0.1
    b_sum = jax.random.normal(k4, (dim,), dtype=jnp.float32) * 0.1
    w_cat = jax.random.normal(k5, (dim, 2 * dim), dtype=jnp.float32) * 0.1
    b_cat = jax.random.normal(k6, (dim,), dtype=jnp.float32) * 0.1

    # (num_nodes, block_rows):
    #   (200, None) -> lane-packed path (g=4), auto-sized tile
    #   (200, 16)   -> lane-packed path, multi-step grid + partial last block
    #   (203, 64)   -> N % g != 0 -> unpacked fallback, masked partial block
    cases = [(200, None), (200, 16), (203, 64)]

    ok = True
    for mode, w, b in (("sum", w_sum, b_sum), ("concat", w_cat, b_cat)):
        params = prepare_aggregator_params(w, b, aggregator=mode)
        for num_nodes, block_rows in cases:
            ks, kn = jax.random.split(jax.random.fold_in(k1, num_nodes), 2)
            self_vecs = jax.random.normal(ks, (num_nodes, dim), dtype=jnp.float32)
            neigh_vecs = jax.random.normal(kn, (num_nodes, dim), dtype=jnp.float32)

            out = aggregator_forward(self_vecs, neigh_vecs, params,
                                     aggregator=mode, block_rows=block_rows)
            out = jax.block_until_ready(out)

            ref_bf16 = aggregator_reference(self_vecs, neigh_vecs, w, b,
                                            aggregator=mode,
                                            matmul_dtype=_MATMUL_DTYPE)
            ref_f32 = aggregator_reference(self_vecs, neigh_vecs, w, b,
                                           aggregator=mode,
                                           matmul_dtype=jnp.float32)
            if not jnp.allclose(out, ref_bf16, atol=2e-3, rtol=2e-3):
                ok = False
                print(f"MISMATCH(bf16 ref) mode={mode} N={num_nodes} "
                      f"block_rows={block_rows} "
                      f"max_err={float(jnp.max(jnp.abs(out - ref_bf16)))}")
            if not jnp.allclose(out, ref_f32, atol=5e-2, rtol=5e-2):
                ok = False
                print(f"MISMATCH(f32 ref)  mode={mode} N={num_nodes} "
                      f"block_rows={block_rows}")

    if ok:
        print("KERNEL_OK")
</pallas_src>

<mosaic_0001>
module attributes {stable_mosaic.version = 11 : i64} {
  func.func @_agg_sum_kernel(%arg0: i32, %arg1: memref<48x128xf32, #tpu.memory_space<vmem>>, %arg2: memref<48x128xf32, #tpu.memory_space<vmem>>, %arg3: memref<128x128xbf16, #tpu.memory_space<vmem>>, %arg4: memref<1x128xf32, #tpu.memory_space<vmem>>, %arg5: memref<48x128xf32, #tpu.memory_space<vmem>>) attributes {dimension_semantics = [#tpu.dimension_semantics<parallel>], iteration_bounds = array<i64: 2>, scalar_prefetch = 0 : i64, scratch_operands = 0 : i64, tpu.core_type = #tpu.core_type<tc>, window_params = [{transform_indices = @transform_0, window_bounds = array<i64: 48, 128>}, {transform_indices = @transform_1, window_bounds = array<i64: 48, 128>}, {pipeline_mode = #tpu.pipeline_mode<synchronous>, transform_indices = @transform_2, window_bounds = array<i64: 128, 128>}, {pipeline_mode = #tpu.pipeline_mode<synchronous>, transform_indices = @transform_3, window_bounds = array<i64: 1, 128>}, {transform_indices = @transform_4, window_bounds = array<i64: 48, 128>}]} {
    %c0 = arith.constant 0 : index
    %c0_0 = arith.constant 0 : index
    %0 = vector.load %arg1[%c0, %c0_0] : memref<48x128xf32, #tpu.memory_space<vmem>>, vector<48x128xf32>
    %c0_1 = arith.constant 0 : index
    %c0_2 = arith.constant 0 : index
    %1 = vector.load %arg2[%c0_1, %c0_2] : memref<48x128xf32, #tpu.memory_space<vmem>>, vector<48x128xf32>
    %2 = arith.addf %0, %1 : vector<48x128xf32>
    %3 = arith.truncf %2 : vector<48x128xf32> to vector<48x128xbf16>
    %c0_3 = arith.constant 0 : index
    %c0_4 = arith.constant 0 : index
    %4 = vector.load %arg3[%c0_3, %c0_4] : memref<128x128xbf16, #tpu.memory_space<vmem>>, vector<128x128xbf16>
    %cst = arith.constant dense<0.000000e+00> : vector<48x128xf32>
    %5 = tpu.matmul %3, %4, %cst {dimension_numbers = #tpu.dot_dimension_numbers<[1], [0], [0], [1], [0, 0, 1, 1], [], []>} : vector<48x128xbf16>, vector<128x128xbf16>, vector<48x128xf32> -> vector<48x128xf32>
    %c0_5 = arith.constant 0 : index
    %c0_6 = arith.constant 0 : index
    %6 = vector.load %arg4[%c0_5, %c0_6] : memref<1x128xf32, #tpu.memory_space<vmem>>, vector<1x128xf32>
    %7 = vector.broadcast %6 : vector<1x128xf32> to vector<48x128xf32>
    %8 = arith.addf %5, %7 : vector<48x128xf32>
    %cst_7 = arith.constant 0.000000e+00 : f32
    %9 = vector.broadcast %cst_7 : f32 to vector<48x128xf32>
    %10 = arith.maximumf %8, %9 : vector<48x128xf32>
    %c0_8 = arith.constant 0 : index
    %c0_9 = arith.constant 0 : index
    %11 = vector.load %arg5[%c0_8, %c0_9] : memref<48x128xf32, #tpu.memory_space<vmem>>, vector<48x128xf32>
    tpu.vector_store %arg5[%c0_8, %c0_9], %10 {strides = array<i32>} : memref<48x128xf32, #tpu.memory_space<vmem>>, vector<48x128xf32>,
    return
  }
  func.func @transform_0(%arg0: i32) -> (i32, i32) {
    %c0_i32 = arith.constant 0 : i32
    %c0_i32_0 = arith.constant 0 : i32
    return %arg0, %c0_i32 : i32, i32
  }
  func.func @transform_1(%arg0: i32) -> (i32, i32) {
    %c0_i32 = arith.constant 0 : i32
    %c0_i32_0 = arith.constant 0 : i32
    return %arg0, %c0_i32 : i32, i32
  }
  func.func @transform_2(%arg0: i32) -> (i32, i32) {
    %c0_i32 = arith.constant 0 : i32
    %c0_i32_0 = arith.constant 0 : i32
    %c0_i32_1 = arith.constant 0 : i32
    return %c0_i32, %c0_i32_0 : i32, i32
  }
  func.func @transform_3(%arg0: i32) -> (i32, i32) {
    %c0_i32 = arith.constant 0 : i32
    %c0_i32_0 = arith.constant 0 : i32
    %c0_i32_1 = arith.constant 0 : i32
    return %c0_i32, %c0_i32_0 : i32, i32
  }
  func.func @transform_4(%arg0: i32) -> (i32, i32) {
    %c0_i32 = arith.constant 0 : i32
    %c0_i32_0 = arith.constant 0 : i32
    return %arg0, %c0_i32 : i32, i32
  }
}

</mosaic_0001>

<bundles_post_ra>
// kernel: aggregator_forward.1
= control target key start
LH: loop header
LB: loop body
LE: loop exit
PB: predicated region body
PF: predicated region fallthrough
CT: control target
= control target key end

     0   :  { %s975_s15 = smov 0   ;;  %s977_s16 = smov 0   ;;  %s1145_s0 = inlined_call_operand.vmem [shape: f32[50,128], index: 0, kind: input, shape index: {}]   ;;  %s1146_s1 = inlined_call_operand.vmem [shape: f32[50,128], index: 1, kind: input, shape index: {}]   ;;  %s1147_s2 = inlined_call_operand.vmem [shape: bf16[128,128], index: 2, kind: input, shape index: {}]   ;;  %s1148_s3 = inlined_call_operand.vmem [shape: f32[1,128], index: 3, kind: input, shape index: {}]   ;;  %s1149_s4 = inlined_call_operand.vmem [shape: f32[50,128], index: 4, kind: output, shape index: {}]  }
   0x1   :  { %s979_s17 = smov 0  }
   0x2 LB: > { %s988_s18 = sadd.s32 4294967295, %s914_s17   ;;  %s990_s19 = sadd.s32 1, %s914_s17   ;;  %s914_s17 = sphi %s979_s17, %s1156_s17   ;;  %s910_s16 = sphi %s977_s16, %s1155_s16   ;;  %s906_s15 = sphi %s975_s15, %s1154_s15  }
   0x3   : > { %s112_s20 = ssub.s32 %s914_s17, %s990_s19  ;;  %s115_s21 = sadd.s32 1, %s910_s16 }
   0x4   : > { %p113_p0 = scmp.eq.s32.totalorder %s112_s20, 0  ;;  %p125_p1 = scmp.ne.s32.totalorder %s910_s16, %s906_s15 }
   0x5   : > { %p126_p2 = scmp.eq.s32.totalorder %s988_s18, 1  ;;  %p676_p3 = scmp.ge.s32.totalorder %s914_s17, 1 }
   0x6   : > { %s998_s22 = scalar_select %p113_p0, %s910_s16, %s115_s21  }
   0x7   : > { %p1000_p4 = por %p126_p2, %p125_p1  ;;  %p190_p5 = scmp.lt.s32.totalorder %s914_s17, 3 }
   0x9   : > { %p191_p6 = pnand %p676_p3, %p190_p5 }
   0xa   : > { %s1013_s28 = smul.u32 (!%p191_p6), 6, %s988_s18  ;;  %s225_s30 = sand.u32 (!%p191_p6), 1, %s906_s15  }
   0xb   : > { %194 = sbr.rel (%p191_p6) target bundleno = 312 (0x138), region = 36 }
   0xc   : > { %p233_p7 = scmp.lt.s32.totalorder (!%p191_p6), %s1013_s28, 6  ;;  %s756_s5 = smul.u32 (!%p191_p6), 48, %s225_s30 }
   0xe   : > { %s1081_s8 = scalar_lea.vmem (!%p191_p6), [#allocation2], %s756_s5  }
  0x10   : > { %v848_v0 = vld [vmem:[%s1147_s2 + $0x38] sm:$0xff]   ;;  %v948_v1 = vmov 0.0   ;;  %v849_v2 = vld [vmem:[%s1147_s2 + $0x30] sm:$0xff]   ;;  %vm949_vm0 = vmmov 0   ;;  %v850_v3 = vld [vmem:[%s1147_s2 + $0x28] sm:$0xff]   ;;  %s234_s7 = scalar_select %p233_p7, %s1013_s28, 6 }
  0x11   : > { %740 = vmatprep.subr.bf16.mxu1 %v948_v1  ;;  %712 = vmatprep.subr.bf16.mxu0 %v948_v1  ;;  %v851_v4 = vld [vmem:[%s1147_s2 + $0x20] sm:$0xff]   ;;  %v852_v5 = vld [vmem:[%s1147_s2 + $0x18] sm:$0xff]   ;;  %v853_v6 = vld [vmem:[%s1147_s2 + $0x10] sm:$0xff]   ;;  %s431_s15 = ssub.s32 (%p1000_p4), 7, %s1013_s28  ;;  %s700_s9 = smul.u32 (%p1000_p4), 48, %s988_s18 }
  0x12   : > { %748 = vmatpush3.bf16.msra.mxu1 %v848_v0  ;;  %713 = vmatpush3.bf16.msra.mxu0 %v848_v0  ;;  %s677_s10 = sshll.u32 %s234_s7, 3  ;;  %v854_v7 = vld [vmem:[%s1147_s2 + $0x8] sm:$0xff]   ;;  %v855_v20 = vld [vmem:[%s1147_s2] sm:$0xff]   ;;  %p432_p8 = scmp.lt.s32.totalorder (%p1000_p4), %s431_s15, 6 }
  0x13   : > { %741 = vmatprep.subr.bf16.mxu1 %v948_v1  ;;  %714 = vmatprep.subr.bf16.mxu0 %v948_v1  ;;  %s1041_s13 = scalar_lea.vmem %s1145_s0, %s677_s10  ;;  %s1049_s24 = scalar_lea.vmem %s1146_s1, %s677_s10  ;;  %v679_v30 = vld [vmem:[%s1148_s3] ss:$0 sm:$0xff] }
  0x14   : > { %732 = vmatprep.mubr.msk.bf16.mxu1 %vm949_vm0, %v948_v1  ;;  %728 = vmatprep.mubr.msk.bf16.mxu0 %vm949_vm0, %v948_v1  ;;  %v264_v8 = vld [vmem:[%s1041_s13 + $0x10] sm:$0xff]  ;;  %v265_v9 = vld [vmem:[%s1041_s13 + $0x18] sm:$0xff]  ;;  %v262_v12 = vld [vmem:[%s1041_s13] sm:$0xff]  ;;  %s1096_s12 = scalar_lea.vmem (%p1000_p4), %s1149_s4, %s700_s9  }
  0x15   : > { %v270_v10 = vld [vmem:[%s1049_s24 + $0x10] sm:$0xff]  ;;  %v271_v11 = vld [vmem:[%s1049_s24 + $0x18] sm:$0xff]  ;;  %v263_v13 = vld [vmem:[%s1041_s13 + $0x8] sm:$0xff] }
  0x16   : > { %749 = vmatpush3.bf16.msra.mxu1 %v849_v2  ;;  %715 = vmatpush3.bf16.msra.mxu0 %v849_v2  ;;  %v268_v14 = vld [vmem:[%s1049_s24] sm:$0xff]  ;;  %v269_v15 = vld [vmem:[%s1049_s24 + $0x8] sm:$0xff]  ;;  %v276_v16 = vadd.f32 %v270_v10, %v264_v8  ;;  %v277_v17 = vadd.f32 %v271_v11, %v265_v9 }
  0x17   : > { %742 = vmatprep.subr.bf16.mxu1 %v948_v1  ;;  %716 = vmatprep.subr.bf16.mxu0 %v948_v1  ;;  %v274_v18 = vadd.f32 %v268_v14, %v262_v12  ;;  %v275_v19 = vadd.f32 %v269_v15, %v263_v13  ;;  %v266_v23 = vld [vmem:[%s1041_s13 + $0x20] sm:$0xff]  ;;  %v267_v24 = vld [vmem:[%s1041_s13 + $0x28] sm:$0xff] }
  0x18   : > { %v281_v21 = vpack.c.bf16 %v277_v17, %v276_v16  ;;  %v272_v25 = vld [vmem:[%s1049_s24 + $0x20] sm:$0xff]  ;;  %v273_v26 = vld [vmem:[%s1049_s24 + $0x28] sm:$0xff] }
  0x19   : > { %v280_v22 = vpack.c.bf16 %v275_v19, %v274_v18  ;;  %v278_v27 = vadd.f32 %v272_v25, %v266_v23  ;;  %v279_v28 = vadd.f32 %v273_v26, %v267_v24 }
  0x1a   : > { %750 = vmatpush3.bf16.msra.mxu1 %v850_v3  ;;  %717 = vmatpush3.bf16.msra.mxu0 %v850_v3 }
  0x1b   : > { %743 = vmatprep.subr.bf16.mxu1 %v948_v1  ;;  %718 = vmatprep.subr.bf16.mxu0 %v948_v1  ;;  %v282_v29 = vpack.c.bf16 %v279_v28, %v278_v27 }
  0x1e   : > { %751 = vmatpush3.bf16.msra.mxu1 %v851_v4  ;;  %719 = vmatpush3.bf16.msra.mxu0 %v851_v4 }
  0x1f   : > { %744 = vmatprep.subr.bf16.mxu1 %v948_v1  ;;  %720 = vmatprep.subr.bf16.mxu0 %v948_v1 }
  0x22   : > { %752 = vmatpush3.bf16.msra.mxu1 %v852_v5  ;;  %721 = vmatpush3.bf16.msra.mxu0 %v852_v5 }
  0x23   : > { %745 = vmatprep.subr.bf16.mxu1 %v948_v1  ;;  %722 = vmatprep.subr.bf16.mxu0 %v948_v1 }
  0x26   : > { %753 = vmatpush3.bf16.msra.mxu1 %v853_v6  ;;  %723 = vmatpush3.bf16.msra.mxu0 %v853_v6 }
  0x27   : > { %746 = vmatprep.subr.bf16.mxu1 %v948_v1  ;;  %724 = vmatprep.subr.bf16.mxu0 %v948_v1 }
  0x2a   : > { %754 = vmatpush3.bf16.msra.mxu1 %v854_v7  ;;  %725 = vmatpush3.bf16.msra.mxu0 %v854_v7 }
  0x2b   : > { %747 = vmatprep.subr.bf16.mxu1 %v948_v1  ;;  %726 = vmatprep.subr.bf16.mxu0 %v948_v1 }
  0x2e   : > { %755 = vmatpush3.bf16.msra.mxu1 %v855_v20  ;;  %727 = vmatpush3.bf16.msra.mxu0 %v855_v20 }
  0x31   : > { %733 = vmatmul.mubr.bf16.vlgmr.msra.gmra.mxu1 %v281_v21  ;;  %729 = vmatmul.mubr.bf16.vlgmr.msra.gmra.mxu0 %v280_v22 }
  0x32   : > { %736 = vmatprep.mubr.msk.bf16.mxu1 %vm949_vm0, %v948_v1 }
  0x39   : > { %737 = vmatmul.mubr.bf16.gmra.mxu1 %v282_v29 }
  0xf1   : > { %v396_v31 = vpop.f32.mrf.mxu1  ;;  %v388_v32 = vpop.f32.mrf.mxu0 }
  0xf2   : > { %v397_v33 = vadd.f32 %v679_v30, %v396_v31  ;;  %v389_v34 = vadd.f32 %v679_v30, %v388_v32 }
  0xf3   : > { %v734_v35 = vpop.f32.mrf.mxu1  ;;  %v730_v36 = vpop.f32.mrf.mxu0 }
  0xf4   : > { %v413_v37 = vmax.f32 %v397_v33, 0.0  ;;  %v411_v38 = vmax.f32 %v389_v34, 0.0 }
  0xf5   : > { %v399_v39 = vpop.f32.mrf.mxu1  ;;  %v391_v40 = vpop.f32.mrf.mxu0 }
  0xf6   : > { %419 = vst [vmem:[%s1081_s8 + $0x10] sm:$0xff] %v413_v37  ;;  %417 = vst [vmem:[%s1081_s8] sm:$0xff] %v411_v38  ;;  %v400_v41 = vadd.f32 %v679_v30, %v399_v39  ;;  %v392_v42 = vadd.f32 %v679_v30, %v391_v40 }
  0xf7   : > { %v735_v43 = vpop.f32.mrf.mxu1  ;;  %v731_v44 = vpop.f32.mrf.mxu0 }
  0xf8   : > { %v414_v45 = vmax.f32 %v400_v41, 0.0  ;;  %v412_v46 = vmax.f32 %v392_v42, 0.0 }
  0xf9   : > { %v404_v47 = vpop.f32.mrf.mxu1 }
  0xfa   : > { %420 = vst [vmem:[%s1081_s8 + $0x18] sm:$0xff] %v414_v45  ;;  %418 = vst [vmem:[%s1081_s8 + $0x8] sm:$0xff] %v412_v46  ;;  %v405_v48 = vadd.f32 %v679_v30, %v404_v47 }
  0xfb   : > { %v738_v49 = vpop.f32.mrf.mxu1 }
  0xfc   : > { %v415_v50 = vmax.f32 %v405_v48, 0.0 }
  0xfd   : > { %v407_v51 = vpop.f32.mrf.mxu1 }
  0xfe   : > { %421 = vst [vmem:[%s1081_s8 + $0x20] sm:$0xff] %v415_v50  ;;  %v408_v52 = vadd.f32 %v679_v30, %v407_v51  ;;  %429 = sbr.rel (!%p1000_p4) target bundleno = 312 (0x138), region = 40 }
  0xff   : > { %v739_v53 = vpop.f32.mrf.mxu1 }
 0x100   : > { %v416_v54 = vmax.f32 %v408_v52, 0.0 }
 0x102   : > { %422 = vst [vmem:[%s1081_s8 + $0x28] sm:$0xff] %v416_v54 }
 0x103   : > { %s1158_s15 = smov (!%p432_p8, %s431_s15), 6 }
 0x104   : > { %s688_s13 = sshll.u32 %s1158_s15, 7 }
 0x105   : > { %p691_p9 = scmp.eq.s32.totalorder %s688_s13, 0 }
 0x106   : > { %856 = sdivrem.u32 (!%p691_p9), %s1158_s15, 6 }
 0x107   : > { %440 = sbr.rel (%p691_p9) target bundleno = 312 (0x138), region = 44 }
 0x10f   : > { %s1102_s23 = spop.drf %856 }
 0x110   : > { %p692_p10 = scmp.le.s32.totalorder %s1102_s23, 0 }
 0x111   : > { %s1151_s18 = smov (!%p692_p10), %s1096_s12  ;;  %s1152_s28 = smov (!%p692_p10), %s1081_s8 }
 0x112   : > { %623 = sbr.rel (%p692_p10) target bundleno = 287 (0x11f), region = 123  ;;  %s1111_s14 = smov (!%p692_p10), 0  }
 0x113   : > { %s1113_s17 = smov (!%p692_p10), 0  }
 0x117 LB: >> { %v515_v55 = vld [vmem:[%s922_s28] sm:$0xff]  ;;  %v517_v56 = vld [vmem:[%s922_s28 + $0x8] sm:$0xff]  ;;  %v519_v57 = vld [vmem:[%s922_s28 + $0x10] sm:$0xff]  ;;  %s527_s20 = sadd.s32 1, %s926_s14  ;;  %s509_s17 = sadd.s32 1, %s930_s17   ;;  %s930_s17 = sphi %s1113_s17, %s509_s17   ;;  %s926_s14 = sphi %s1111_s14, %s1153_s14   ;;  %s922_s28 = sphi %s1152_s28, %s532_s28   ;;  %s918_s18 = sphi %s1151_s18, %s533_s18  }
 0x118   : >> { %516 = vst [vmem:[%s918_s18] sm:$0xff] %v515_v55  ;;  %518 = vst [vmem:[%s918_s18 + $0x8] sm:$0xff] %v517_v56  ;;  %v521_v58 = vld [vmem:[%s922_s28 + $0x18] sm:$0xff]  ;;  %v523_v59 = vld [vmem:[%s922_s28 + $0x20] sm:$0xff]  ;;  %p528_p11 = scmp.ge.s32.totalorder %s527_s20, %s1102_s23  ;;  %p508_p12 = scmp.ge.s32.totalorder %s509_s17, %s1102_s23 }
 0x119   : >> { %520 = vst [vmem:[%s918_s18 + $0x10] sm:$0xff] %v519_v57  ;;  %v525_v60 = vld [vmem:[%s922_s28 + $0x28] sm:$0xff]  ;;  %522 = vst [vmem:[%s918_s18 + $0x18] sm:$0xff] %v521_v58 }
 0x11a   : >> { %524 = vst [vmem:[%s918_s18 + $0x20] sm:$0xff] %v523_v59  ;;  %526 = vst [vmem:[%s918_s18 + $0x28] sm:$0xff] %v525_v60  ;;  %s1160_s20 = smov (%p528_p11, %s527_s20), 0  ;;  %511 = sbr.rel (!%p508_p12) target bundleno = 279 (0x117), region = 129 }
 0x11b   : >> { %s530_s21 = smul.u32 48, %s1160_s20  ;;  %s1153_s14 = smov %s1160_s20 }
 0x11d   : >> { %s532_s28 = scalar_lea.vmem %s1081_s8, %s530_s21 [#allocation2]   ;;  %s533_s18 = scalar_lea.vmem %s1096_s12, %s530_s21  }
 0x11f PF: > { %858 = sdivrem.u32 %s1158_s15, 6 }
 0x120   : > { %s693_s24 = smul.u32 48, %s1102_s23 }
 0x122   : > { %s538_s25 = scalar_lea.vmem %s1081_s8, %s693_s24 [#allocation2]   ;;  %s540_s26 = scalar_lea.vmem %s1096_s12, %s693_s24  }
 0x128   : > { %s859_s27 = spop.drf %858 }
 0x129   : > { %p695_p13 = scmp.le.s32.totalorder %s859_s27, 0 }
 0x12a   : > { %s932_s29 = smov (!%p695_p13), %s540_s26   ;;  %s936_s30 = smov (!%p695_p13), %s538_s25  }
 0x12b   : > { %637 = sbr.rel (%p695_p13) target bundleno = 312 (0x138), region = 134  ;;  %s940_s5 = smov (!%p695_p13), 0  }
 0x12c   : > { %s944_s6 = smov (!%p695_p13), 0  }
 0x130 LB: >> { %v550_v61 = vld [vmem:[%s938_s30] sm:$0xff]  ;;  %s552_s7 = sadd.s32 1, %s942_s5  ;;  %s544_s6 = sadd.s32 1, %s946_s6   ;;  %s946_s6 = sphi %s944_s6, %s544_s6   ;;  %s942_s5 = sphi %s940_s5, %s941_s5   ;;  %s938_s30 = sphi %s936_s30, %s557_s30   ;;  %s934_s29 = sphi %s932_s29, %s558_s29  }
 0x131   : >> { %551 = vst [vmem:[%s934_s29] sm:$0xff] %v550_v61  ;;  %p553_p0 = scmp.ge.s32.totalorder %s552_s7, %s859_s27  ;;  %p543_p1 = scmp.ge.s32.totalorder %s544_s6, %s859_s27 }
 0x133   : >> { %s1162_s7 = smov (%p553_p0, %s552_s7), 0  ;;  %546 = sbr.rel (!%p543_p1) target bundleno = 304 (0x130), region = 140 }
 0x134   : >> { %s696_s8 = sshll.u32 %s1162_s7, 3  ;;  %s941_s5 = smov %s1162_s7  }
 0x135   : >> { %s557_s30 = scalar_lea.vmem %s538_s25, %s696_s8 [#allocation2]   ;;  %s558_s29 = scalar_lea.vmem %s540_s26, %s696_s8  }
 0x138 PF: > { %p11_p2 = scmp.ge.s32.totalorder %s990_s19, 4   ;;  %s1154_s15 = smov %s910_s16 }
 0x139   : > { %s1155_s16 = smov %s998_s22  ;;  %s1156_s17 = smov %s990_s19 }
 0x13a   :  { %13 = sbr.rel (!%p11_p2) target bundleno = 2 (0x2), region = 151 }

</bundles_post_ra>
